<compile_context>
chip_gen: v7x
topology: tpu7x:2x2x1
jax: 0.10.0
libtpu: 0.0.40
codegen_flags: <defaults>
</compile_context>

<pallas_src>
import functools

import jax
import jax.numpy as jnp
from jax.experimental import pallas as pl
from jax.experimental.pallas import tpu as pltpu


def _clip_reward_kernel(x_ref, t_ref, dhat_ref, y_ref, *, c1, c2):
    # x_ref: (TM, D), t_ref: (1, D), dhat_ref: (1, D), y_ref: (TM, 1)
    x = x_ref[...].astype(jnp.float32)

    # x = x / ||x|| along last dim (keepdim broadcast). rsqrt -> EUP slot.
    sq_norm = jnp.sum(x * x, axis=-1, keepdims=True)
    x = x * jax.lax.rsqrt(sq_norm)

    # diff = x - target (broadcast over rows)
    diff = x - t_ref[...].astype(jnp.float32)

    # Rank-1 + scaled-identity projection, reduced analytically:
    #   ||diff @ P||^2 = c1 * ||diff||^2 + c2 * (diff . d_hat)^2
    diff_sq = jnp.sum(diff * diff, axis=-1, keepdims=True)            # (TM, 1)
    proj = jnp.sum(diff * dhat_ref[...].astype(jnp.float32),
                   axis=-1, keepdims=True)                            # (TM, 1)

    y_ref[...] = 1.0 - 0.5 * (c1 * diff_sq + c2 * proj * proj)


def clip_reward_pallas(x, target, direction, alpha, *, tm=None):
    """x: (N, D), target: (1, D), direction: (1, D) -> y: (N,) float32.

    direction is target - baseline (un-normalized); d_hat is computed here.
    """
    n, d = x.shape

    # Unit direction vector (rank-1 axis of the projection).
    d_hat = direction / jnp.linalg.norm(direction, axis=-1, keepdims=True)

    # Scalars derived from alpha (compile-time constants).
    c1 = float((1.0 - alpha) ** 2)
    c2 = float(alpha * alpha + 2.0 * alpha * (1.0 - alpha))

    # Row-tile size. Big tiles amortize per-grid-step overhead; cap keeps the
    # double-buffered x tile comfortably inside v7x's smaller VMEM (2 bufs *
    # TM*D*4B). Round up to a multiple of 8 for the sublane tiling constraint.
    if tm is None:
        tm = min(n, 1024)
    tm = -(-tm // 8) * 8

    # Pad rows to a multiple of tm. Pad value 1.0 keeps the padded rows'
    # norms nonzero (results for padded rows are discarded).
    n_pad = -(-n // tm) * tm
    if n_pad != n:
        x = jnp.pad(x, ((0, n_pad - n), (0, 0)), constant_values=1.0)

    grid = (n_pad // tm,)

    cost = pl.CostEstimate(
        flops=8 * n_pad * d,           # normalize + diff + two reductions
        transcendentals=n_pad,          # rsqrt per row
        bytes_accessed=n_pad * d * 4 + 2 * d * 4 + n_pad * 4,
    )

    kernel = functools.partial(_clip_reward_kernel, c1=c1, c2=c2)

    y = pl.pallas_call(
        kernel,
        out_shape=jax.ShapeDtypeStruct((n_pad, 1), jnp.float32),
        grid_spec=pl.GridSpec(
            grid=grid,
            in_specs=[
                pl.BlockSpec((tm, d), lambda i: (i, 0)),   # streamed x tile
                pl.BlockSpec((1, d), lambda i: (0, 0)),    # resident target
                pl.BlockSpec((1, d), lambda i: (0, 0)),    # resident d_hat
            ],
            out_specs=pl.BlockSpec((tm, 1), lambda i: (i, 0)),
        ),
        compiler_params=pltpu.CompilerParams(
            dimension_semantics=("parallel",)),   # 2-TC sharding on v7x
        cost_estimate=cost,
    )(x, target, d_hat)

    return y[:n, 0]


# ---------------- parameter construction (glue, matches __init__) ------------

def _normalize_rows(v):
    return v / jnp.linalg.norm(v, axis=-1, keepdims=True)


def make_clip_reward_params(key, d, alpha, n_target_prompts=3, n_baseline_prompts=3):
    """Synthetic deterministic stand-in for embed_prompts(): random prompt
    embeddings are L2-normalized per row, then averaged (keepdim)."""
    k_t, k_b = jax.random.split(key)
    tgt_emb = _normalize_rows(
        jax.random.normal(k_t, (n_target_prompts, d), jnp.float32))
    base_emb = _normalize_rows(
        jax.random.normal(k_b, (n_baseline_prompts, d), jnp.float32))
    target = jnp.mean(tgt_emb, axis=0, keepdims=True)      # (1, D)
    baseline = jnp.mean(base_emb, axis=0, keepdims=True)   # (1, D)
    direction = target - baseline                           # (1, D)

    # projection = alpha * d^T d / ||d||^2 + (1 - alpha) * I   (reference only)
    proj = (direction.T @ direction) / (jnp.linalg.norm(direction) ** 2)
    identity = jnp.eye(proj.shape[0], dtype=jnp.float32)
    projection = alpha * proj + (1.0 - alpha) * identity    # (D, D)
    return target, baseline, direction, projection


def clip_reward_ref(x, target, projection):
    """Pure-JAX reference of the PyTorch forward, for verification."""
    x = x / jnp.linalg.norm(x, axis=-1, keepdims=True)
    z = (x - target) @ projection
    return 1.0 - jnp.linalg.norm(z, axis=-1) ** 2 / 2.0


if __name__ == "__main__":
    key = jax.random.PRNGKey(0)
    N, D = 8, 32          # small shapes: 8 video embeddings of dim 32
    alpha = 0.5

    k_params, k_x = jax.random.split(key)
    target, baseline, direction, projection = make_clip_reward_params(
        k_params, D, alpha)

    # x plays the role of embed_module output (video embeddings), (N, D)
    # TODO(synk): CLIPEmbed's S3D/CLIP video+text encoders are full networks,
    # not a single kernel; they are stubbed by synthetic embeddings here.
    x = jax.random.normal(k_x, (N, D), jnp.float32)

    y = clip_reward_pallas(x, target, direction, alpha)
    y = jax.block_until_ready(y)

    y_ref = clip_reward_ref(x, target, projection)
    assert y.shape == (N,)
    assert jnp.allclose(y, y_ref, atol=1e-5, rtol=1e-5), (y, y_ref)

    print("KERNEL_OK")
</pallas_src>

<mosaic_0001>
module attributes {stable_mosaic.version = 11 : i64} {
  func.func @_clip_reward_kernel(%arg0: i32, %arg1: memref<8x32xf32, #tpu.memory_space<vmem>>, %arg2: memref<1x32xf32, #tpu.memory_space<vmem>>, %arg3: memref<1x32xf32, #tpu.memory_space<vmem>>, %arg4: memref<8x1xf32, #tpu.memory_space<vmem>>) attributes {dimension_semantics = [#tpu.dimension_semantics<parallel>], iteration_bounds = array<i64: 1>, scalar_prefetch = 0 : i64, scratch_operands = 0 : i64, tpu.core_type = #tpu.core_type<tc>, window_params = [{transform_indices = @transform_0, window_bounds = array<i64: 8, 32>}, {pipeline_mode = #tpu.pipeline_mode<synchronous>, transform_indices = @transform_1, window_bounds = array<i64: 1, 32>}, {pipeline_mode = #tpu.pipeline_mode<synchronous>, transform_indices = @transform_2, window_bounds = array<i64: 1, 32>}, {transform_indices = @transform_3, window_bounds = array<i64: 8, 1>}]} {
    %c0 = arith.constant 0 : index
    %c0_0 = arith.constant 0 : index
    %0 = vector.load %arg1[%c0, %c0_0] : memref<8x32xf32, #tpu.memory_space<vmem>>, vector<8x32xf32>
    %1 = arith.mulf %0, %0 : vector<8x32xf32>
    %cst = arith.constant dense<0.000000e+00> : vector<8xf32>
    %2 = vector.multi_reduction <add>, %1, %cst [1] : vector<8x32xf32> to vector<8xf32>
    %3 = vector.shape_cast %2 : vector<8xf32> to vector<8x1xf32>
    %4 = math.rsqrt %3 : vector<8x1xf32>
    %5 = vector.broadcast %4 : vector<8x1xf32> to vector<8x32xf32>
    %6 = arith.mulf %0, %5 : vector<8x32xf32>
    %c0_1 = arith.constant 0 : index
    %c0_2 = arith.constant 0 : index
    %7 = vector.load %arg2[%c0_1, %c0_2] : memref<1x32xf32, #tpu.memory_space<vmem>>, vector<1x32xf32>
    %8 = vector.broadcast %7 : vector<1x32xf32> to vector<8x32xf32>
    %9 = arith.subf %6, %8 : vector<8x32xf32>
    %10 = arith.mulf %9, %9 : vector<8x32xf32>
    %cst_3 = arith.constant dense<0.000000e+00> : vector<8xf32>
    %11 = vector.multi_reduction <add>, %10, %cst_3 [1] : vector<8x32xf32> to vector<8xf32>
    %12 = vector.shape_cast %11 : vector<8xf32> to vector<8x1xf32>
    %c0_4 = arith.constant 0 : index
    %c0_5 = arith.constant 0 : index
    %13 = vector.load %arg3[%c0_4, %c0_5] : memref<1x32xf32, #tpu.memory_space<vmem>>, vector<1x32xf32>
    %14 = vector.broadcast %13 : vector<1x32xf32> to vector<8x32xf32>
    %15 = arith.mulf %9, %14 : vector<8x32xf32>
    %cst_6 = arith.constant dense<0.000000e+00> : vector<8xf32>
    %16 = vector.multi_reduction <add>, %15, %cst_6 [1] : vector<8x32xf32> to vector<8xf32>
    %17 = vector.shape_cast %16 : vector<8xf32> to vector<8x1xf32>
    %cst_7 = arith.constant 2.500000e-01 : f32
    %18 = vector.broadcast %cst_7 : f32 to vector<8x1xf32>
    %19 = arith.mulf %18, %12 : vector<8x1xf32>
    %cst_8 = arith.constant 7.500000e-01 : f32
    %20 = vector.broadcast %cst_8 : f32 to vector<8x1xf32>
    %21 = arith.mulf %20, %17 : vector<8x1xf32>
    %22 = arith.mulf %21, %17 : vector<8x1xf32>
    %23 = arith.addf %19, %22 : vector<8x1xf32>
    %cst_9 = arith.constant 5.000000e-01 : f32
    %24 = vector.broadcast %cst_9 : f32 to vector<8x1xf32>
    %25 = arith.mulf %24, %23 : vector<8x1xf32>
    %cst_10 = arith.constant 1.000000e+00 : f32
    %26 = vector.broadcast %cst_10 : f32 to vector<8x1xf32>
    %27 = arith.subf %26, %25 : vector<8x1xf32>
    %c0_11 = arith.constant 0 : index
    %c0_12 = arith.constant 0 : index
    %28 = vector.load %arg4[%c0_11, %c0_12] : memref<8x1xf32, #tpu.memory_space<vmem>>, vector<8x1xf32>
    tpu.vector_store %arg4[%c0_11, %c0_12], %27 {strides = array<i32>} : memref<8x1xf32, #tpu.memory_space<vmem>>, vector<8x1xf32>,
    return
  }
  func.func @transform_0(%arg0: i32) -> (i32, i32) {
    %c0_i32 = arith.constant 0 : i32
    %c0_i32_0 = arith.constant 0 : i32
    return %arg0, %c0_i32 : i32, i32
  }
  func.func @transform_1(%arg0: i32) -> (i32, i32) {
    %c0_i32 = arith.constant 0 : i32
    %c0_i32_0 = arith.constant 0 : i32
    %c0_i32_1 = arith.constant 0 : i32
    return %c0_i32, %c0_i32_0 : i32, i32
  }
  func.func @transform_2(%arg0: i32) -> (i32, i32) {
    %c0_i32 = arith.constant 0 : i32
    %c0_i32_0 = arith.constant 0 : i32
    %c0_i32_1 = arith.constant 0 : i32
    return %c0_i32, %c0_i32_0 : i32, i32
  }
  func.func @transform_3(%arg0: i32) -> (i32, i32) {
    %c0_i32 = arith.constant 0 : i32
    %c0_i32_0 = arith.constant 0 : i32
    return %arg0, %c0_i32 : i32, i32
  }
}

</mosaic_0001>

<bundles_post_ra>
// kernel: tpu_custom_call.1
= control target key start
LH: loop header
LB: loop body
LE: loop exit
PB: predicated region body
PF: predicated region fallthrough
CT: control target
= control target key end

     0   :  { %8 = vsyncpa [#allocation3], 0  ;;  %s99_s12 = smov [#allocation2]   ;;  %s141_s0 = inlined_call_operand.hbm [shape: f32[8,32], index: 0, kind: input, shape index: {}]   ;;  %s142_s1 = inlined_call_operand.vmem [shape: f32[1,32], index: 1, kind: input, shape index: {}]   ;;  %s143_s2 = inlined_call_operand.vmem [shape: f32[1,32], index: 2, kind: input, shape index: {}]   ;;  %s144_s3 = inlined_call_operand.vmem [shape: f32[8,1], index: 3, kind: output, shape index: {}]  }
   0x1   :  { %s15_s13 = sshll.u32 %s99_s12, 4  ;;  %s75_s16 = scalar_lea.hbm %s141_s0, 128  ;;  %s16_s13 = int_to_ptr.vmem [resolvable:$true] %s15_s13 }
   0x2   :  { %p76_p0 = scmp.ne.s32.totalorder %s141_s0, %s75_s16  ;;  %p79_p1 = scmp.lt.u32.totalorder %s75_s16, %s141_s0 }
   0x4   :  { %p81_p2 = pnand %p79_p1, %p76_p0 }
   0x6   :  { %84 = shalt.err (!%p81_p2)
}
   0x7   :  { %s85_s21 = scalar_lea.vmem %s16_s13, 128  ;;  %p90_p4 = scmp.lt.s32.totalorder %s16_s13, %s16_s13 }
   0x8   :  { %p86_p3 = scmp.ne.s32.totalorder %s16_s13, %s85_s21  ;;  %p91_p5 = scmp.lt.s32.totalorder %s85_s21, %s85_s21 }
   0xa   :  { %p92_p6 = por %p91_p5, %p90_p4 }
   0xc   :  { %p93_p7 = pnand %p92_p6, %p86_p3 }
   0xe   :  { %96 = shalt.err (!%p93_p7)
}
   0xf   :  { %18 = dma.hbm_to_vmem [thread:$0]  %s141_s0, 128, %s16_s13, [#allocation3]  }
  0x10   :  { %97 = dma.done.wait [#allocation3], 128  }
  0x11   :  { %98 = vsyncadd [#allocation3], 4294967168  ;;  %v26_v0 = vld [vmem:[#allocation2] sm:$0xff]  ;;  %vm28_vm0 = vcmask 261120   ;;  %v70_v5 = vld [vmem:[%s142_s1] ss:$0 sm:$0xff] }
  0x12   :  { %v27_v1 = vmul.f32 %v26_v0, %v26_v0  ;;  %v71_v7 = vld [vmem:[%s143_s2] ss:$0 sm:$0xff]  ;;  %vm63_vm1 = vcmask 7168  }
  0x14   :  { %v29_v2 = vsel %vm28_vm0, %v27_v1, 0.0 }
  0x15   :  { %30 = vadd.xlane.f32.xlu0 %v29_v2 }
  0xa2   :  { %v31_v3 = vpop.xlane.xlu0 %30 }
  0xa3   :  { %73 = vrsqrt.f32 %v31_v3 }
  0xad   :  { %v74_v4 = vpop.eup %73 }
  0xae   :  { %v33_v6 = vmul.f32 %v74_v4, %v26_v0 }
  0xb0   :  { %v41_v8 = vsub.f32 %v33_v6, %v70_v5 }
  0xb2   :  { %v53_v9 = vmul.f32 %v71_v7, %v41_v8  ;;  %v42_v10 = vmul.f32 %v41_v8, %v41_v8 }
  0xb4   :  { %v54_v11 = vsel %vm28_vm0, %v53_v9, 0.0  ;;  %v43_v12 = vsel %vm28_vm0, %v42_v10, 0.0 }
  0xb5   :  { %55 = vadd.xlane.f32.xlu0 %v54_v11  ;;  %44 = vadd.xlane.f32.xlu1 %v43_v12 }
 0x142   :  { %v56_v13 = vpop.xlane.xlu0 %55  ;;  %v45_v14 = vpop.xlane.xlu1 %44 }
 0x143   :  { %v58_v15 = vmul.f32 0.75, %v56_v13  ;;  %v57_v17 = vmul.f32 0.25, %v45_v14 }
 0x145   :  { %v59_v16 = vmul.f32 %v58_v15, %v56_v13 }
 0x147   :  { %v60_v18 = vadd.f32 %v59_v16, %v57_v17 }
 0x149   :  { %v61_v19 = vmul.f32 0.5, %v60_v18 }
 0x14b   :  { %v62_v20 = vsub.f32 1.0, %v61_v19 }
 0x14d   :  { %64 = vst.msk [vmem:[%s144_s3] sm:$0xff] %vm63_vm1, %v62_v20 }
 0x14e   :  { %69 = vsyncpa [#allocation3], 1 }

</bundles_post_ra>
